<compile_context>
chip_gen: v5e
topology: v5e:2x2
jax: 0.10.0
libtpu: 0.0.40
codegen_flags: <defaults>
</compile_context>

<pallas_src>
import jax
import jax.numpy as jnp
from jax.experimental import pallas as pl
from jax.experimental.pallas import tpu as pltpu


def _round_up(x, m):
    return ((x + m - 1) // m) * m


# --------------------------------------------------------------------------
# Kernel 1: fused Linear(D, 2) + ReLU over the stacked [context; anchors] rows.
# --------------------------------------------------------------------------
def _norm_kernel(x_ref, w_ref, b_ref, o_ref):
    # One MXU pass per row tile: relu(x @ W_pad + b_pad).  W_pad has 8 output
    # lanes (cols 2..7 zero); the narrow store is masked, but the 16x smaller
    # HBM writeback dominates that cost.
    y = jnp.dot(x_ref[...], w_ref[...], preferred_element_type=jnp.float32)
    o_ref[...] = jnp.maximum(y + b_ref[...], 0.0)


# --------------------------------------------------------------------------
# Kernel 2: rank-2 (VPU) attention + fused mask / epsilon select.
#   ctx_ref: (CTX_TILE, 8)  lanes 0,1 = ctx_norm features, lane 2 = ctx_mask
#   anc_ref: (8, ANC_TILE)  rows  0,1 = anc_norm features, row  2 = anchor_mask
# --------------------------------------------------------------------------
def _make_att_kernel(has_ctx_mask: bool, has_anchor_mask: bool, epsilon):
    def kernel(ctx_ref, anc_ref, att_ref):
        # attention = ctx_norm @ anc_norm.T as a rank-2 broadcast-FMA (pure
        # VPU/XLU, no MXU pass, no in-kernel transpose).
        # TODO(synk): on v7x (HBM no longer binding) consider pre-broadcasting
        # the two ctx features lane-wide if the broadcast/vst slot saturates.
        c0 = ctx_ref[:, 0:1]
        c1 = ctx_ref[:, 1:2]
        a0 = anc_ref[0:1, :]
        a1 = anc_ref[1:2, :]
        att = c0 * a0 + c1 * a1

        # ctx mask, anchor mask and epsilon-neighbourhood collapse into one
        # keep-predicate + single select (equivalent to the sequential
        # reference because markoff_value = 0 and ReLU => att >= 0).
        keep = None
        if has_ctx_mask:
            keep = ctx_ref[:, 2:3] != 0.0
        if has_anchor_mask:
            am = anc_ref[2:3, :] != 0.0
            keep = am if keep is None else (keep & am)
        if epsilon is not None:
            gt = att > epsilon
            keep = gt if keep is None else (keep & gt)
        if keep is not None:
            att = jnp.where(keep, att, 0.0)

        att_ref[...] = att.astype(att_ref.dtype)

    return kernel


# --------------------------------------------------------------------------
# Wrapper
# --------------------------------------------------------------------------
def anchor_graph_learner(context, anchors, mlp_w, mlp_b,
                         ctx_mask=None, anchor_mask=None,
                         epsilon=None, topk=None,
                         ctx_tile=1024, anc_tile=2048, norm_tile=1024,
                         att_dtype=jnp.float32, matmul_in_bf16=False):
    """Pallas implementation of AnchorGraphLearner.forward.

    context: (N_ctx, D), anchors: (N_anchor, D)
    mlp_w:   (D, 2) (transposed nn.Linear weight), mlp_b: (2,)
    Returns (attention (N_ctx, N_anchor) att_dtype, context_norm (N_ctx, 2) f32).
    """
    n_ctx, d = context.shape
    n_anchor = anchors.shape[0]

    # Keep bf16 inputs as bf16 (full-rate MXU, f32 accumulate); don't re-cast
    # f32 inputs unless matmul_in_bf16 is requested.
    if matmul_in_bf16 or context.dtype == jnp.bfloat16:
        compute_dtype = jnp.bfloat16
    else:
        compute_dtype = jnp.float32

    def _cast(x, dt):
        return x if x.dtype == dt else x.astype(dt)

    # ---------------- stage 1: fused relu(Linear) over stacked rows ----------
    rows = n_ctx + n_anchor
    norm_tile = _round_up(min(rows, norm_tile), 8)
    rows_pad = _round_up(rows, norm_tile)

    stacked = jnp.concatenate(
        [_cast(context, compute_dtype), _cast(anchors, compute_dtype)], axis=0)
    if rows_pad != rows:
        stacked = jnp.pad(stacked, ((0, rows_pad - rows), (0, 0)))

    w_pad = jnp.zeros((d, 8), compute_dtype).at[:, :2].set(_cast(mlp_w, compute_dtype))
    b_pad = jnp.zeros((1, 8), jnp.float32).at[0, :2].set(_cast(mlp_b, jnp.float32))

    norm = pl.pallas_call(
        _norm_kernel,
        out_shape=jax.ShapeDtypeStruct((rows_pad, 8), jnp.float32),
        grid=(rows_pad // norm_tile,),
        in_specs=[pl.BlockSpec((norm_tile, d), lambda i: (i, 0)),
                  pl.BlockSpec((d, 8), lambda i: (0, 0)),      # W pinned
                  pl.BlockSpec((1, 8), lambda i: (0, 0))],     # b pinned
        out_specs=pl.BlockSpec((norm_tile, 8), lambda i: (i, 0)),
        compiler_params=pltpu.CompilerParams(
            dimension_semantics=("parallel",),
            vmem_limit_bytes=32 * 1024 * 1024),
    )(stacked, w_pad, b_pad)

    context_norm = norm[:n_ctx, :2]

    # ---------------- stage 2: tiled rank-2 attention -------------------------
    ctx_tile = _round_up(min(n_ctx, ctx_tile), 8)
    anc_tile = _round_up(min(n_anchor, anc_tile), 128)
    n_ctx_pad = _round_up(n_ctx, ctx_tile)
    n_anchor_pad = _round_up(n_anchor, anc_tile)

    # ctx carrier: (n_ctx_pad, 8); lanes 0,1 = features, lane 2 = ctx_mask.
    ctx_car = norm[:n_ctx]
    if ctx_mask is not None:
        cm = ctx_mask.reshape(n_ctx).astype(jnp.int32).astype(jnp.float32)
        ctx_car = ctx_car.at[:, 2].set(cm)
    if n_ctx_pad != n_ctx:
        ctx_car = jnp.pad(ctx_car, ((0, n_ctx_pad - n_ctx), (0, 0)))

    # anchor carrier: (8, n_anchor_pad); rows 0,1 = features^T, row 2 = mask.
    anc_car = jnp.zeros((8, n_anchor_pad), jnp.float32)
    anc_car = anc_car.at[:2, :n_anchor].set(norm[n_ctx:n_ctx + n_anchor, :2].T)
    if anchor_mask is not None:
        am = anchor_mask.reshape(n_anchor).astype(jnp.int32).astype(jnp.float32)
        anc_car = anc_car.at[2, :n_anchor].set(am)

    att_kernel = _make_att_kernel(
        ctx_mask is not None, anchor_mask is not None,
        None if epsilon is None else float(epsilon))

    attention = pl.pallas_call(
        att_kernel,
        out_shape=jax.ShapeDtypeStruct((n_ctx_pad, n_anchor_pad), att_dtype),
        grid=(n_ctx_pad // ctx_tile, n_anchor_pad // anc_tile),
        in_specs=[pl.BlockSpec((ctx_tile, 8), lambda i, j: (i, 0)),
                  pl.BlockSpec((8, anc_tile), lambda i, j: (0, j))],
        out_specs=pl.BlockSpec((ctx_tile, anc_tile), lambda i, j: (i, j)),
        compiler_params=pltpu.CompilerParams(
            dimension_semantics=("parallel", "parallel"),
            vmem_limit_bytes=32 * 1024 * 1024),
    )(ctx_car, anc_car)

    attention = attention[:n_ctx, :n_anchor]

    if topk is not None:
        # TODO(synk): top-k + scatter_ (build_knn_neighbourhood) stays in plain
        # JAX; a Pallas per-row-tile top-k is a possible future optimization.
        k = min(topk, attention.shape[-1])
        knn_val, knn_ind = jax.lax.top_k(attention, k)
        rows_idx = jnp.arange(attention.shape[0])[:, None]
        attention = jnp.zeros_like(attention).at[rows_idx, knn_ind].set(knn_val)

    return attention, context_norm


# --------------------------------------------------------------------------
# Reference + demo
# --------------------------------------------------------------------------
def _reference(context, anchors, mlp_w, mlp_b,
               ctx_mask=None, anchor_mask=None, epsilon=None, topk=None):
    ctx_norm = jnp.maximum(context @ mlp_w + mlp_b, 0.0)
    anc_norm = jnp.maximum(anchors @ mlp_w + mlp_b, 0.0)
    att = ctx_norm @ anc_norm.T
    if ctx_mask is not None:
        att = jnp.where(ctx_mask.reshape(-1, 1) != 0, att, 0.0)
    if anchor_mask is not None:
        att = jnp.where(anchor_mask.reshape(1, -1) != 0, att, 0.0)
    if epsilon is not None:
        att = jnp.where(att > epsilon, att, 0.0)
    if topk is not None:
        k = min(topk, att.shape[-1])
        v, idx = jax.lax.top_k(att, k)
        att = jnp.zeros_like(att).at[jnp.arange(att.shape[0])[:, None], idx].set(v)
    return att, ctx_norm


if __name__ == "__main__":
    # Small deterministic shapes consistent with forward():
    # context: (N_ctx, input_size), anchors: (N_anchor, input_size).
    input_size = 32
    n_ctx = 16
    n_anchor = 8

    key = jax.random.PRNGKey(0)
    k1, k2, k3, k4 = jax.random.split(key, 4)

    context = jax.random.normal(k1, (n_ctx, input_size), dtype=jnp.float32)
    anchors = jax.random.normal(k2, (n_anchor, input_size), dtype=jnp.float32)

    # Deterministic xavier-uniform-style init for MLP_'s Linear(input_size, 2).
    bound = (6.0 / (input_size + 2)) ** 0.5
    mlp_w = jax.random.uniform(k3, (input_size, 2), jnp.float32, -bound, bound)
    mlp_b = jax.random.uniform(k4, (2,), jnp.float32, -0.1, 0.1)
    # Note: self.weight_tensor (num_pers, input_size) is defined in __init__
    # but never used in forward(), so it is intentionally omitted.

    # --- base path (no masks / epsilon / topk) ---
    attention, context_norm = anchor_graph_learner(context, anchors, mlp_w, mlp_b)
    jax.block_until_ready((attention, context_norm))
    ref_att, ref_ctxn = _reference(context, anchors, mlp_w, mlp_b)
    assert attention.shape == (n_ctx, n_anchor)
    assert context_norm.shape == (n_ctx, 2)
    assert jnp.allclose(attention, ref_att, atol=1e-5, rtol=1e-5)
    assert jnp.allclose(context_norm, ref_ctxn, atol=1e-5, rtol=1e-5)

    # --- masked + epsilon + topk path ---
    ctx_mask = (jnp.arange(n_ctx) % 3 != 0).astype(jnp.float32)
    anchor_mask = (jnp.arange(n_anchor) % 2 == 0).astype(jnp.float32)
    att2, ctxn2 = anchor_graph_learner(context, anchors, mlp_w, mlp_b,
                                       ctx_mask=ctx_mask, anchor_mask=anchor_mask,
                                       epsilon=0.05, topk=4)
    jax.block_until_ready((att2, ctxn2))
    ref_att2, ref_ctxn2 = _reference(context, anchors, mlp_w, mlp_b,
                                     ctx_mask=ctx_mask, anchor_mask=anchor_mask,
                                     epsilon=0.05, topk=4)
    assert jnp.allclose(att2, ref_att2, atol=1e-5, rtol=1e-5)
    assert jnp.allclose(ctxn2, ref_ctxn2, atol=1e-5, rtol=1e-5)

    print("KERNEL_OK")
</pallas_src>

<mosaic_0001>
module attributes {stable_mosaic.version = 11 : i64} {
  func.func @_norm_kernel(%arg0: i32, %arg1: memref<24x32xf32, #tpu.memory_space<vmem>>, %arg2: memref<32x8xf32, #tpu.memory_space<vmem>>, %arg3: memref<1x8xf32, #tpu.memory_space<vmem>>, %arg4: memref<24x8xf32, #tpu.memory_space<vmem>>) attributes {dimension_semantics = [#tpu.dimension_semantics<parallel>], iteration_bounds = array<i64: 1>, scalar_prefetch = 0 : i64, scratch_operands = 0 : i64, tpu.core_type = #tpu.core_type<tc>, window_params = [{transform_indices = @transform_0, window_bounds = array<i64: 24, 32>}, {pipeline_mode = #tpu.pipeline_mode<synchronous>, transform_indices = @transform_1, window_bounds = array<i64: 32, 8>}, {pipeline_mode = #tpu.pipeline_mode<synchronous>, transform_indices = @transform_2, window_bounds = array<i64: 1, 8>}, {transform_indices = @transform_3, window_bounds = array<i64: 24, 8>}]} {
    %c0 = arith.constant 0 : index
    %c0_0 = arith.constant 0 : index
    %0 = vector.load %arg1[%c0, %c0_0] : memref<24x32xf32, #tpu.memory_space<vmem>>, vector<24x32xf32>
    %c0_1 = arith.constant 0 : index
    %c0_2 = arith.constant 0 : index
    %1 = vector.load %arg2[%c0_1, %c0_2] : memref<32x8xf32, #tpu.memory_space<vmem>>, vector<32x8xf32>
    %cst = arith.constant dense<0.000000e+00> : vector<24x8xf32>
    %2 = tpu.matmul %0, %1, %cst {dimension_numbers = #tpu.dot_dimension_numbers<[1], [0], [0], [1], [0, 0, 1, 1], [], []>} : vector<24x32xf32>, vector<32x8xf32>, vector<24x8xf32> -> vector<24x8xf32>
    %c0_3 = arith.constant 0 : index
    %c0_4 = arith.constant 0 : index
    %3 = vector.load %arg3[%c0_3, %c0_4] : memref<1x8xf32, #tpu.memory_space<vmem>>, vector<1x8xf32>
    %4 = vector.broadcast %3 : vector<1x8xf32> to vector<24x8xf32>
    %5 = arith.addf %2, %4 : vector<24x8xf32>
    %cst_5 = arith.constant 0.000000e+00 : f32
    %6 = vector.broadcast %cst_5 : f32 to vector<24x8xf32>
    %7 = arith.maximumf %5, %6 : vector<24x8xf32>
    %c0_6 = arith.constant 0 : index
    %c0_7 = arith.constant 0 : index
    %8 = vector.load %arg4[%c0_6, %c0_7] : memref<24x8xf32, #tpu.memory_space<vmem>>, vector<24x8xf32>
    tpu.vector_store %arg4[%c0_6, %c0_7], %7 {strides = array<i32>} : memref<24x8xf32, #tpu.memory_space<vmem>>, vector<24x8xf32>,
    return
  }
  func.func @transform_0(%arg0: i32) -> (i32, i32) {
    %c0_i32 = arith.constant 0 : i32
    %c0_i32_0 = arith.constant 0 : i32
    return %arg0, %c0_i32 : i32, i32
  }
  func.func @transform_1(%arg0: i32) -> (i32, i32) {
    %c0_i32 = arith.constant 0 : i32
    %c0_i32_0 = arith.constant 0 : i32
    %c0_i32_1 = arith.constant 0 : i32
    return %c0_i32, %c0_i32_0 : i32, i32
  }
  func.func @transform_2(%arg0: i32) -> (i32, i32) {
    %c0_i32 = arith.constant 0 : i32
    %c0_i32_0 = arith.constant 0 : i32
    %c0_i32_1 = arith.constant 0 : i32
    return %c0_i32, %c0_i32_0 : i32, i32
  }
  func.func @transform_3(%arg0: i32) -> (i32, i32) {
    %c0_i32 = arith.constant 0 : i32
    %c0_i32_0 = arith.constant 0 : i32
    return %arg0, %c0_i32 : i32, i32
  }
}

</mosaic_0001>

<bundles_post_ra>
// kernel: tpu_custom_call.1
= control target key start
LH: loop header
LB: loop body
LE: loop exit
PB: predicated region body
PF: predicated region fallthrough
CT: control target
= control target key end

     0   :  { %vm25_vm0 = vcmask 261120   ;;  %vm64_vm1 = vcmask 64512   ;;  %s137_s1 = inlined_call_operand.vmem [shape: f32[32,8], index: 1, kind: input, shape index: {}]   ;;  %s138_s2 = inlined_call_operand.vmem [shape: f32[1,8], index: 2, kind: input, shape index: {}]   ;;  %s139_s0 = inlined_call_operand.vmem [shape: f32[24,32], index: 0, kind: input, shape index: {}]   ;;  %s140_s3 = inlined_call_operand.vmem [shape: f32[24,8], index: 3, kind: output, shape index: {}]  }
   0x1   :  { %v20_v0 = vld [vmem:[%s137_s1 + $0x18] sm:$0xff]  ;;  %v19_v1 = vld [vmem:[%s137_s1 + $0x10] sm:$0xff]  ;;  %v18_v2 = vld [vmem:[%s137_s1 + $0x8] sm:$0xff] }
   0x2   :  { %76 = vmatpush.msra.mxu2 %v20_v0  ;;  %47 = vmatpush.msra.mxu0 %v20_v0  ;;  %v17_v3 = vld [vmem:[%s137_s1] sm:$0xff]  ;;  %v16_v4 = vld [vmem:[%s139_s0 + $0x10] sm:$0xff]  ;;  %v15_v6 = vld [vmem:[%s139_s0 + $0x8] sm:$0xff] }
   0x3   :  { %75 = vmatpush.msra.mxu1 %v20_v0  ;;  %v14_v5 = vld [vmem:[%s139_s0] sm:$0xff] }
   0x4   :  { %78 = vmatpush.msra.mxu2 %v19_v1  ;;  %48 = vmatpush.msra.mxu0 %v19_v1  ;;  %v83_v7 = vld [vmem:[%s138_s2] ss:$0 sm:$0xff] }
   0x5   :  { %77 = vmatpush.msra.mxu1 %v19_v1 }
   0x6   :  { %80 = vmatpush.msra.mxu2 %v18_v2  ;;  %49 = vmatpush.msra.mxu0 %v18_v2 }
   0x7   :  { %79 = vmatpush.msra.mxu1 %v18_v2 }
   0x8   :  { %82 = vmatpush.msra.mxu2 %v17_v3  ;;  %50 = vmatpush.msra.mxu0 %v17_v3 }
   0x9   :  { %74 = vmatmul.msk.f32.vlgmr.msra.gmra.mxu2 %vm25_vm0, %v16_v4  ;;  %81 = vmatpush.msra.mxu1 %v17_v3 }
   0xa   :  { %72 = vmatmul.msk.f32.vlgmr.msra.gmra.mxu0 %vm25_vm0, %v14_v5  ;;  %73 = vmatmul.msk.f32.vlgmr.msra.gmra.mxu1 %vm25_vm0, %v15_v6 }
  0x87   :  { %v52_v8 = vpop.f32.mrf.mxu0  ;;  %v55_v9 = vpop.f32.mrf.mxu1 }
  0x88   :  { %v53_v10 = vadd.f32 %v83_v7, %v52_v8  ;;  %v56_v11 = vadd.f32 %v83_v7, %v55_v9 }
  0x8a   :  { %v61_v12 = vmax.f32 %v53_v10, 0.0  ;;  %v62_v13 = vmax.f32 %v56_v11, 0.0 }
  0x8c   :  { %65 = vst.msk [vmem:[%s140_s3] sm:$0xff] %vm64_vm1, %v61_v12  ;;  %v58_v14 = vpop.f32.mrf.mxu2 }
  0x8d   :  { %66 = vst.msk [vmem:[%s140_s3 + $0x8] sm:$0xff] %vm64_vm1, %v62_v13  ;;  %v59_v15 = vadd.f32 %v83_v7, %v58_v14 }
  0x8f   :  { %v63_v16 = vmax.f32 %v59_v15, 0.0 }
  0x91   :  { %67 = vst.msk [vmem:[%s140_s3 + $0x10] sm:$0xff] %vm64_vm1, %v63_v16 }

</bundles_post_ra>
